<compile_context>
chip_gen: v6e
topology: v6e:2x2x1
jax: 0.10.0
libtpu: 0.0.40
codegen_flags: <defaults>
</compile_context>

<pallas_src>
import jax
import jax.numpy as jnp
from jax.experimental import pallas as pl
from jax.experimental.pallas import tpu as pltpu


def qnet_kernel(x_ref, w1b1_ref, w2b2_ref, o_ref):
    # x_ref    : VMEM (B, 1)    f32
    # w1b1_ref : VMEM (2, H)    f32
    # w2b2_ref : VMEM (H+1, A)  f32
    # o_ref    : VMEM (B, A)    f32
    H = w2b2_ref.shape[0] - 1

    x = x_ref[...]                          # (B, 1)
    w1 = w1b1_ref[0:1, :]                   # (1, H)
    b1 = w1b1_ref[1:2, :]                   # (1, H)

    # fc1: contraction dim K == 1  =>  outer product; pure VPU broadcast multiply.
    h = jnp.maximum(x * w1 + b1, 0.0)       # (B, H)

    w2 = w2b2_ref[0:H, :]                   # (H, A)
    b2 = w2b2_ref[H:H + 1, :]               # (1, A)

    # fc2: single tiny MXU matmul, accumulated in f32.
    out = jnp.dot(h, w2, preferred_element_type=jnp.float32) + b2   # (B, A)
    o_ref[...] = out.astype(o_ref.dtype)


def qnet_forward(x, w1b1, w2b2):
    """Fused Qnet forward.  x: (B, 1) or (B,); params packed as built by init_qnet_params."""
    if x.ndim == 1:
        x = x[:, None]
    assert x.shape[1] == 1, "kernel is specialized for state_dim == 1"
    B = x.shape[0]
    A = w2b2.shape[1]

    vmem = pl.BlockSpec(memory_space=pltpu.MemorySpace.VMEM)
    return pl.pallas_call(
        qnet_kernel,
        out_shape=jax.ShapeDtypeStruct((B, A), jnp.float32),
        in_specs=[vmem, vmem, vmem],
        out_specs=vmem,
    )(x.astype(jnp.float32), w1b1.astype(jnp.float32), w2b2.astype(jnp.float32))


def init_qnet_params(key, state_dim, hidden_dim, action_dim):
    """Mimics torch.nn.Linear default init, returns pre-packed parameter slabs."""
    assert state_dim == 1, "kernel is specialized for state_dim == 1"
    k1, k2, k3, k4 = jax.random.split(key, 4)
    bound1 = 1.0 / float(state_dim) ** 0.5
    bound2 = 1.0 / float(hidden_dim) ** 0.5
    w1 = jax.random.uniform(k1, (state_dim, hidden_dim), jnp.float32, -bound1, bound1)
    b1 = jax.random.uniform(k2, (1, hidden_dim), jnp.float32, -bound1, bound1)
    w2 = jax.random.uniform(k3, (hidden_dim, action_dim), jnp.float32, -bound2, bound2)
    b2 = jax.random.uniform(k4, (1, action_dim), jnp.float32, -bound2, bound2)
    w1b1 = jnp.concatenate([w1, b1], axis=0)   # (2, H)
    w2b2 = jnp.concatenate([w2, b2], axis=0)   # (H+1, A)
    return w1b1, w2b2


if __name__ == "__main__":
    state_dim = 1     # FrozenLake state encoded as a single scalar
    hidden_dim = 12
    action_dim = 4    # FrozenLake-v1 action space
    batch = 2

    key = jax.random.PRNGKey(0)
    kx, kp = jax.random.split(key)
    x = jax.random.uniform(kx, (batch, state_dim), jnp.float32, 0.0, 25.0)
    w1b1, w2b2 = init_qnet_params(kp, state_dim, hidden_dim, action_dim)

    out = qnet_forward(x, w1b1, w2b2)
    out = jax.block_until_ready(out)

    # Pure-JAX reference (PyTorch semantics: relu(x @ W1 + b1) @ W2 + b2).
    w1, b1 = w1b1[0:1, :], w1b1[1:2, :]
    w2, b2 = w2b2[:hidden_dim, :], w2b2[hidden_dim:, :]
    ref = jnp.maximum(x @ w1 + b1, 0.0) @ w2 + b2

    assert out.shape == (batch, action_dim)
    assert jnp.allclose(out, ref, atol=1e-5, rtol=1e-5)

    print("KERNEL_OK")
</pallas_src>

<mosaic_0001>
module attributes {stable_mosaic.version = 11 : i64} {
  func.func @qnet_kernel(%arg0: memref<2x1xf32, #tpu.memory_space<vmem>>, %arg1: memref<2x12xf32, #tpu.memory_space<vmem>>, %arg2: memref<13x4xf32, #tpu.memory_space<vmem>>, %arg3: memref<2x4xf32, #tpu.memory_space<vmem>>) attributes {dimension_semantics = [], scalar_prefetch = 0 : i64, scratch_operands = 0 : i64, tpu.core_type = #tpu.core_type<tc>} {
    %c0 = arith.constant 0 : index
    %c0_0 = arith.constant 0 : index
    %0 = vector.load %arg0[%c0, %c0_0] : memref<2x1xf32, #tpu.memory_space<vmem>>, vector<2x1xf32>
    %c0_1 = arith.constant 0 : index
    %c0_2 = arith.constant 0 : index
    %1 = vector.load %arg1[%c0_1, %c0_2] : memref<2x12xf32, #tpu.memory_space<vmem>>, vector<1x12xf32>
    %c1 = arith.constant 1 : index
    %c0_3 = arith.constant 0 : index
    %2 = vector.load %arg1[%c1, %c0_3] : memref<2x12xf32, #tpu.memory_space<vmem>>, vector<1x12xf32>
    %3 = vector.broadcast %0 : vector<2x1xf32> to vector<2x12xf32>
    %4 = vector.broadcast %1 : vector<1x12xf32> to vector<2x12xf32>
    %5 = arith.mulf %3, %4 : vector<2x12xf32>
    %6 = vector.broadcast %2 : vector<1x12xf32> to vector<2x12xf32>
    %7 = arith.addf %5, %6 : vector<2x12xf32>
    %cst = arith.constant 0.000000e+00 : f32
    %8 = vector.broadcast %cst : f32 to vector<2x12xf32>
    %9 = arith.maximumf %7, %8 : vector<2x12xf32>
    %c0_4 = arith.constant 0 : index
    %c0_5 = arith.constant 0 : index
    %10 = vector.load %arg2[%c0_4, %c0_5] : memref<13x4xf32, #tpu.memory_space<vmem>>, vector<12x4xf32>
    %c12 = arith.constant 12 : index
    %c0_6 = arith.constant 0 : index
    %11 = vector.load %arg2[%c12, %c0_6] : memref<13x4xf32, #tpu.memory_space<vmem>>, vector<1x4xf32>
    %cst_7 = arith.constant dense<0.000000e+00> : vector<2x4xf32>
    %12 = tpu.matmul %9, %10, %cst_7 {dimension_numbers = #tpu.dot_dimension_numbers<[1], [0], [0], [1], [0, 0, 1, 1], [], []>} : vector<2x12xf32>, vector<12x4xf32>, vector<2x4xf32> -> vector<2x4xf32>
    %13 = vector.broadcast %11 : vector<1x4xf32> to vector<2x4xf32>
    %14 = arith.addf %12, %13 : vector<2x4xf32>
    %c0_8 = arith.constant 0 : index
    %c0_9 = arith.constant 0 : index
    %15 = vector.load %arg3[%c0_8, %c0_9] : memref<2x4xf32, #tpu.memory_space<vmem>>, vector<2x4xf32>
    tpu.vector_store %arg3[%c0_8, %c0_9], %14 {strides = array<i32>} : memref<2x4xf32, #tpu.memory_space<vmem>>, vector<2x4xf32>,
    return
  }
}

</mosaic_0001>

<bundles_post_ra>
// kernel: tpu_custom_call.1
= control target key start
LH: loop header
LB: loop body
LE: loop exit
PB: predicated region body
PF: predicated region fallthrough
CT: control target
= control target key end

     0   :  { %v177_v1 = vmov 0   ;;  %v178_v2 = vmov 0.0   ;;  %vm45_vm0 = vcmask 1043456   ;;  %s222_s0 = inlined_call_operand.vmem [shape: f32[2,1], index: 0, kind: input, shape index: {}]   ;;  %s223_s1 = inlined_call_operand.vmem [shape: f32[2,12], index: 1, kind: input, shape index: {}]   ;;  %s224_s2 = inlined_call_operand.vmem [shape: f32[13,4], index: 2, kind: input, shape index: {}]   ;;  %s225_s3 = inlined_call_operand.hbm [shape: f32[2,4], index: 3, kind: output, shape index: {}]  }
   0x1   :  { %v15_v0 = vld [vmem:[%s222_s0] sm:$0x3]  ;;  %154 = vset.pattern.permute.xlu0 %v177_v1  ;;  %143 = vmatprep.subr.mxu0 %v178_v2  ;;  %v35_v3 = vld [vmem:[%s224_s2 + $0x8] sm:$0xf] }
   0x2   :  { %20 = vperm.xlu0 %154, %v15_v0   ;;  %144 = vmatpush3.msk.msra.mxu0 %vm45_vm0, %v35_v3  ;;  %v34_v4 = vld [vmem:[%s224_s2] sm:$0xff] }
   0x3   :  { %8 = vsyncpa [#allocation3], 0  ;;  %145 = vmatprep.subr.mxu0 %v178_v2  ;;  %vm179_vm1 = vmmov 0   ;;  %v135_v5 = vld [vmem:[%s223_s1] ss:$0 sm:$0xff]  ;;  %vm41_vm2 = vcmask 97280  }
   0x4   :  { %147 = vmatprep.mubr.msk.f32.mxu0 %vm179_vm1, %v178_v2  ;;  %146 = vmatpush3.msra.mxu0 %v34_v4  ;;  %v136_v6 = vld [vmem:[%s223_s1 + $0x1] ss:$0 sm:$0xff]  ;;  %v137_v11 = vld [vmem:[%s224_s2 + $0xc] ss:$0 sm:$0xff]  ;;  %s180_s23 = smov [#allocation2]   ;;  %vm119_vm3 = vcmask 25600  }
   0x5   :  { %s127_s24 = sshll.u32 %s180_s23, 4  ;;  %s128_s24 = int_to_ptr.vmem [resolvable:$true] %s127_s24 }
   0x6   :  { %s155_s25 = scalar_lea.vmem %s128_s24, 32  ;;  %p160_p1 = scmp.lt.s32.totalorder %s128_s24, %s128_s24 }
   0x7   :  { %p156_p0 = scmp.ne.s32.totalorder %s128_s24, %s155_s25  ;;  %p161_p2 = scmp.lt.s32.totalorder %s155_s25, %s155_s25 }
   0x9   :  { %p162_p3 = por %p161_p2, %p160_p1 }
   0xb   :  { %p163_p4 = pnand %p162_p3, %p156_p0 }
  0x7d   :  { %v21_v7 = vpop.permute.xlu0 %20 }
  0x7e   :  { %v27_v8 = vmul.f32 %v135_v5, %v21_v7 }
  0x80   :  { %v32_v9 = vadd.f32 %v136_v6, %v27_v8 }
  0x82   :  { %v33_v10 = vmax.f32 %v32_v9, 0.0 }
  0x84   :  { %148 = vmatmul.mubr.msk.f32.vlgmr.msra.gmra.mxu0 %vm41_vm2, %v33_v10 }
 0x144   :  { %v115_v12 = vpop.f32.mrf.mxu0 }
 0x145   :  { %v116_v13 = vadd.f32 %v137_v11, %v115_v12 }
 0x146   :  { %v149_v14 = vpop.f32.mrf.mxu0 }
 0x147   :  { %120 = vst.msk [vmem:[#allocation2] sm:$0x3] %vm119_vm3, %v116_v13 }
 0x148   :  { %166 = shalt.err (!%p163_p4)
}
 0x149   :  { %130 = dma.vmem_to_hbm [thread:$0]  %s128_s24, 32, %s225_s3, [#allocation3]  }
 0x14a   :  { %175 = dma.done.wait [#allocation3], 32  }
 0x14b   :  { %176 = vsyncadd [#allocation3], 4294967264 }
 0x14c   :  { %134 = vsyncpa [#allocation3], 1 }

</bundles_post_ra>
